<compile_context>
chip_gen: v7x
topology: tpu7x:2x2x1
jax: 0.10.0
libtpu: 0.0.40
codegen_flags: <defaults>
</compile_context>

<pallas_src>
import jax
import jax.numpy as jnp
from jax.experimental import pallas as pl
from jax.experimental.pallas import tpu as pltpu

# ----------------------------- configuration ---------------------------------
IMG_C, IMG_H, IMG_W = 3, 32, 32
BB_CH = 32              # backbone output channels
RPN_CH = 32             # RPN hidden channels
ANCHOR_SIZES = (4.0, 8.0, 16.0)
NUM_ANCHORS = len(ANCHOR_SIZES)
TOPK = 64               # proposals per image
ROI_GRID = 4            # pooled ROI grid (ROI_GRID x ROI_GRID)
FC_DIM = 128
NUM_CLASSES = 8         # foreground classes (+1 background column)
LANE = 128              # pad narrow head outputs to one full lane group
DELTA_CLAMP = 4.0       # dw/dh clamp (detectron2 uses log(1000/16)≈4.135)


# ============================ Pallas kernels ==================================

def pallas_matmul_bias(x, w, b, relu=False, tm=512):
    """out = (x @ w + b), optional ReLU.  x:(M,K) w:(K,N) b:(1,N).  Pads M to tm."""
    M, K = x.shape
    Nout = w.shape[1]
    Mp = pl.cdiv(M, tm) * tm
    if Mp != M:
        x = jnp.pad(x, ((0, Mp - M), (0, 0)))

    def kernel(x_ref, w_ref, b_ref, o_ref):
        acc = jnp.dot(x_ref[...], w_ref[...],
                      preferred_element_type=jnp.float32) + b_ref[...]
        if relu:
            acc = jnp.maximum(acc, 0.0)
        o_ref[...] = acc.astype(o_ref.dtype)

    out = pl.pallas_call(
        kernel,
        out_shape=jax.ShapeDtypeStruct((Mp, Nout), jnp.float32),
        grid=(Mp // tm,),
        in_specs=[pl.BlockSpec((tm, K), lambda i: (i, 0)),
                  pl.BlockSpec((K, Nout), lambda i: (0, 0)),
                  pl.BlockSpec((1, Nout), lambda i: (0, 0))],
        out_specs=pl.BlockSpec((tm, Nout), lambda i: (i, 0)),
        compiler_params=pltpu.CompilerParams(dimension_semantics=("parallel",)),
    )(x, w, b)
    return out[:M]


def pallas_rpn_fused(feat_flat, w_conv, b_conv, w_head, b_head, H, W):
    """Fused RPN: 3x3 conv (+bias+ReLU) + fused 1x1 objectness|delta head, per image.

    feat_flat: (N, R2, C) zero-padded feature, flattened over the (H+2, W+2) plane
               (row r = y*(W+2)+x) plus a few tail junk rows so every tap's
               contiguous row window stays in-bounds.
    Output:    (N*H*(W+2), Dh) in padded-width row order; the 2 junk columns per
               row are sliced off in JAX.  No im2col patches ever hit HBM, and the
               head output is a lane-dense 128-wide store.
    """
    N, R2, C = feat_flat.shape
    W2 = W + 2
    HW2 = H * W2
    Cout = w_conv.shape[1]
    Dh = w_head.shape[1]

    def kernel(x_ref, wc_ref, bc_ref, wh_ref, bh_ref, o_ref):
        acc = jnp.zeros((HW2, Cout), jnp.float32)
        for t in range(9):                                 # static unroll: 9 taps
            dy, dx = divmod(t, 3)
            r0 = dy * W2 + dx
            tap = x_ref[0, r0:r0 + HW2, :]                 # plain row slice, no reshape
            acc = acc + jnp.dot(tap, wc_ref[t * C:(t + 1) * C, :],
                                preferred_element_type=jnp.float32)
        h = jnp.maximum(acc + bc_ref[...], 0.0)
        o_ref[...] = (jnp.dot(h, wh_ref[...], preferred_element_type=jnp.float32)
                      + bh_ref[...])

    return pl.pallas_call(
        kernel,
        out_shape=jax.ShapeDtypeStruct((N * HW2, Dh), jnp.float32),
        grid=(N,),
        in_specs=[pl.BlockSpec((1, R2, C), lambda n: (n, 0, 0)),
                  pl.BlockSpec((9 * C, Cout), lambda n: (0, 0)),
                  pl.BlockSpec((1, Cout), lambda n: (0, 0)),
                  pl.BlockSpec((Cout, Dh), lambda n: (0, 0)),
                  pl.BlockSpec((1, Dh), lambda n: (0, 0))],
        out_specs=pl.BlockSpec((HW2, Dh), lambda n: (n, 0)),
        compiler_params=pltpu.CompilerParams(dimension_semantics=("parallel",)),
    )(feat_flat, w_conv, b_conv, w_head, b_head)


def pallas_box_head(pooled, w1, b1, w2, b2, wh, bh, tr=64):
    """Fused ROI box head: FC->ReLU->FC->ReLU->fused (cls|box) head, lane-padded."""
    R, P = pooled.shape
    F1, F2, Dh = w1.shape[1], w2.shape[1], wh.shape[1]
    Rp = pl.cdiv(R, tr) * tr
    if Rp != R:
        pooled = jnp.pad(pooled, ((0, Rp - R), (0, 0)))

    def kernel(x_ref, w1_ref, b1_ref, w2_ref, b2_ref, wh_ref, bh_ref, o_ref):
        h = jnp.maximum(jnp.dot(x_ref[...], w1_ref[...],
                                preferred_element_type=jnp.float32) + b1_ref[...], 0.0)
        h = jnp.maximum(jnp.dot(h, w2_ref[...],
                                preferred_element_type=jnp.float32) + b2_ref[...], 0.0)
        o_ref[...] = jnp.dot(h, wh_ref[...],
                             preferred_element_type=jnp.float32) + bh_ref[...]

    out = pl.pallas_call(
        kernel,
        out_shape=jax.ShapeDtypeStruct((Rp, Dh), jnp.float32),
        grid=(Rp // tr,),
        in_specs=[pl.BlockSpec((tr, P), lambda i: (i, 0)),
                  pl.BlockSpec((P, F1), lambda i: (0, 0)),
                  pl.BlockSpec((1, F1), lambda i: (0, 0)),
                  pl.BlockSpec((F1, F2), lambda i: (0, 0)),
                  pl.BlockSpec((1, F2), lambda i: (0, 0)),
                  pl.BlockSpec((F2, Dh), lambda i: (0, 0)),
                  pl.BlockSpec((1, Dh), lambda i: (0, 0))],
        out_specs=pl.BlockSpec((tr, Dh), lambda i: (i, 0)),
        compiler_params=pltpu.CompilerParams(dimension_semantics=("parallel",)),
    )(pooled, w1, b1, w2, b2, wh, bh)
    return out[:R]


def pallas_decode_postprocess(props_T, deltas_T, scale_T, clip_T):
    """Single batched call over all images: decode boxes from deltas, scale to the
    requested output resolution, clip.  Transposed (4, R) layout keeps every store
    lane-dense along R = N*TOPK."""
    R = props_T.shape[1]

    def kernel(p_ref, d_ref, s_ref, c_ref, o_ref):
        p = p_ref[...]
        d = d_ref[...]
        w = p[2:3, :] - p[0:1, :]
        h = p[3:4, :] - p[1:2, :]
        cx = p[0:1, :] + 0.5 * w
        cy = p[1:2, :] + 0.5 * h
        dw = jnp.minimum(d[2:3, :], DELTA_CLAMP)
        dh = jnp.minimum(d[3:4, :], DELTA_CLAMP)
        pcx = cx + d[0:1, :] * w
        pcy = cy + d[1:2, :] * h
        pw = w * jnp.exp(dw)
        ph = h * jnp.exp(dh)
        s = s_ref[...]
        c = c_ref[...]
        o_ref[0:1, :] = jnp.minimum(jnp.maximum((pcx - 0.5 * pw) * s[0:1, :], 0.0), c[0:1, :])
        o_ref[1:2, :] = jnp.minimum(jnp.maximum((pcy - 0.5 * ph) * s[1:2, :], 0.0), c[1:2, :])
        o_ref[2:3, :] = jnp.minimum(jnp.maximum((pcx + 0.5 * pw) * s[2:3, :], 0.0), c[2:3, :])
        o_ref[3:4, :] = jnp.minimum(jnp.maximum((pcy + 0.5 * ph) * s[3:4, :], 0.0), c[3:4, :])

    return pl.pallas_call(
        kernel,
        out_shape=jax.ShapeDtypeStruct((4, R), jnp.float32),
        grid=(1,),
        in_specs=[pl.BlockSpec((4, R), lambda i: (0, 0))] * 4,
        out_specs=pl.BlockSpec((4, R), lambda i: (0, 0)),
    )(props_T, deltas_T, scale_T, clip_T)


# ============================== JAX glue ======================================

def im2col_3x3(x):
    """x: (N,H,W,C) -> (N,H,W,9*C), stride 1, 'SAME' padding. (Backbone only: 27 cols.)"""
    N, H, W, C = x.shape
    xp = jnp.pad(x, ((0, 0), (1, 1), (1, 1), (0, 0)))
    cols = []
    for dy in range(3):
        for dx in range(3):
            cols.append(xp[:, dy:dy + H, dx:dx + W, :])
    return jnp.concatenate(cols, axis=-1)


def make_anchors(H, W, sizes):
    ys, xs = jnp.meshgrid(jnp.arange(H, dtype=jnp.float32) + 0.5,
                          jnp.arange(W, dtype=jnp.float32) + 0.5, indexing="ij")
    centers = jnp.stack([xs, ys], axis=-1).reshape(-1, 2)       # (H*W, 2) = (cx, cy)
    per_size = []
    for s in sizes:
        half = s / 2.0
        per_size.append(jnp.concatenate([centers - half, centers + half], axis=-1))
    return jnp.stack(per_size, axis=1)                          # (H*W, A, 4)


def decode_boxes(anchors, deltas):
    """anchors (...,4) x1y1x2y2; deltas (...,4) dx,dy,dw,dh. (JAX; proposal stage only.)"""
    w = anchors[..., 2] - anchors[..., 0]
    h = anchors[..., 3] - anchors[..., 1]
    cx = anchors[..., 0] + 0.5 * w
    cy = anchors[..., 1] + 0.5 * h
    dx, dy = deltas[..., 0], deltas[..., 1]
    dw = jnp.minimum(deltas[..., 2], DELTA_CLAMP)
    dh = jnp.minimum(deltas[..., 3], DELTA_CLAMP)
    pcx = cx + dx * w
    pcy = cy + dy * h
    pw = w * jnp.exp(dw)
    ph = h * jnp.exp(dh)
    return jnp.stack([pcx - 0.5 * pw, pcy - 0.5 * ph,
                      pcx + 0.5 * pw, pcy + 0.5 * ph], axis=-1)


def roi_pool_onehot(feat, boxes, grid=ROI_GRID):
    """Nearest-neighbour ROI pooling as two one-hot contractions (MXU-friendly,
    avoids XLA gather).  feat: (H,W,C), boxes: (R,4)."""
    # TODO(synk): real ROIAlign uses bilinear sampling; this is nearest-neighbour.
    H, W, C = feat.shape
    x1, y1, x2, y2 = boxes[:, 0], boxes[:, 1], boxes[:, 2], boxes[:, 3]
    bw = jnp.maximum(x2 - x1, 1e-3)
    bh = jnp.maximum(y2 - y1, 1e-3)
    steps = (jnp.arange(grid, dtype=jnp.float32) + 0.5) / grid
    sx = x1[:, None] + steps[None, :] * bw[:, None]             # (R, grid)
    sy = y1[:, None] + steps[None, :] * bh[:, None]
    ix = jnp.clip(jnp.floor(sx), 0, W - 1).astype(jnp.int32)
    iy = jnp.clip(jnp.floor(sy), 0, H - 1).astype(jnp.int32)
    ey = (iy[:, :, None] == jnp.arange(H)[None, None, :]).astype(feat.dtype)  # (R,g,H)
    ex = (ix[:, :, None] == jnp.arange(W)[None, None, :]).astype(feat.dtype)  # (R,g,W)
    rows = jnp.einsum('rgh,hwc->rgwc', ey, feat)                # one-hot row gather
    pooled = jnp.einsum('rxw,rgwc->rgxc', ex, rows)             # one-hot col gather
    return pooled.reshape(boxes.shape[0], grid * grid * C)


# ============================ parameters ======================================

def init_params(key):
    ks = jax.random.split(key, 10)
    s = 0.05
    return {
        "pixel_mean": jnp.array([103.53, 116.28, 123.675], jnp.float32),
        "pixel_std": jnp.array([57.375, 57.12, 58.395], jnp.float32),
        # backbone: 3x3 conv, 3 -> BB_CH
        "bb_w": jax.random.normal(ks[0], (9 * IMG_C, BB_CH), jnp.float32) * s,
        "bb_b": jnp.zeros((1, BB_CH), jnp.float32),
        # RPN head: 3x3 conv BB_CH -> RPN_CH, 1x1 objectness, 1x1 deltas
        "rpn_wh": jax.random.normal(ks[1], (9 * BB_CH, RPN_CH), jnp.float32) * s,
        "rpn_bh": jnp.zeros((1, RPN_CH), jnp.float32),
        "rpn_wo": jax.random.normal(ks[2], (RPN_CH, NUM_ANCHORS), jnp.float32) * s,
        "rpn_bo": jnp.zeros((1, NUM_ANCHORS), jnp.float32),
        "rpn_wd": jax.random.normal(ks[3], (RPN_CH, 4 * NUM_ANCHORS), jnp.float32) * s,
        "rpn_bd": jnp.zeros((1, 4 * NUM_ANCHORS), jnp.float32),
        # ROI box head
        "fc1_w": jax.random.normal(ks[4], (ROI_GRID * ROI_GRID * BB_CH, FC_DIM), jnp.float32) * s,
        "fc1_b": jnp.zeros((1, FC_DIM), jnp.float32),
        "fc2_w": jax.random.normal(ks[5], (FC_DIM, FC_DIM), jnp.float32) * s,
        "fc2_b": jnp.zeros((1, FC_DIM), jnp.float32),
        "cls_w": jax.random.normal(ks[6], (FC_DIM, NUM_CLASSES + 1), jnp.float32) * s,
        "cls_b": jnp.zeros((1, NUM_CLASSES + 1), jnp.float32),
        "box_w": jax.random.normal(ks[7], (FC_DIM, 4), jnp.float32) * s,
        "box_b": jnp.zeros((1, 4), jnp.float32),
    }


def fuse_params(p):
    """Fold normalization into the backbone conv and fuse/pad narrow head matmuls
    to lane-dense 128-wide outputs (done once, outside the per-forward path)."""
    fp = dict(p)
    inv_std = 1.0 / p["pixel_std"]
    # 1/std folded into bb_w rows (mean subtract is fused with the NHWC transpose
    # in JAX so that zero conv padding keeps exactly the original semantics).
    fp["bb_w_folded"] = p["bb_w"] * jnp.tile(inv_std, 9)[:, None]
    # RPN: concat objectness | deltas, zero-pad to 128 output lanes.
    wh = jnp.concatenate([p["rpn_wo"], p["rpn_wd"]], axis=1)
    bh = jnp.concatenate([p["rpn_bo"], p["rpn_bd"]], axis=1)
    fp["rpn_w_head"] = jnp.pad(wh, ((0, 0), (0, LANE - wh.shape[1])))
    fp["rpn_b_head"] = jnp.pad(bh, ((0, 0), (0, LANE - bh.shape[1])))
    # Box head: concat cls | box regression, zero-pad to 128 output lanes.
    wb = jnp.concatenate([p["cls_w"], p["box_w"]], axis=1)
    bb = jnp.concatenate([p["cls_b"], p["box_b"]], axis=1)
    fp["box_w_head"] = jnp.pad(wb, ((0, 0), (0, LANE - wb.shape[1])))
    fp["box_b_head"] = jnp.pad(bb, ((0, 0), (0, LANE - bb.shape[1])))
    return fp


# ============================ forward / inference =============================

def generalized_rcnn_inference(params, batched_inputs):
    """Mirrors GeneralizedRCNN.inference(...) with do_postprocess=True."""
    # --- preprocess_image: mean subtract fused with NCHW->NHWC transpose; 1/std is
    #     folded into the backbone conv weights (no separate normalize pass/kernel) ---
    imgs = jnp.stack([bi["image"] for bi in batched_inputs]).astype(jnp.float32)  # (N,C,H,W)
    x_nhwc = jnp.transpose(imgs - params["pixel_mean"][None, :, None, None], (0, 2, 3, 1))
    N, H, W, _ = x_nhwc.shape
    image_sizes = [(H, W)] * N

    # --- backbone: im2col (27-wide, negligible) + Pallas matmul (tm=512, 4 steps) ---
    patches = im2col_3x3(x_nhwc).reshape(N * H * W, -1)
    feat = pallas_matmul_bias(patches, params["bb_w_folded"], params["bb_b"],
                              relu=True, tm=512)
    feat = feat.reshape(N, H, W, BB_CH)

    # --- proposal generator (RPN): fused conv3x3 + heads, no im2col in HBM ---
    W2 = W + 2
    feat_pad = jnp.pad(feat, ((0, 0), (1, 1), (1, 1), (0, 0)))          # (N,H+2,W+2,C)
    feat_flat = feat_pad.reshape(N, (H + 2) * W2, BB_CH)
    feat_flat = jnp.pad(feat_flat, ((0, 0), (0, 8), (0, 0)))            # tap-window tail
    head = pallas_rpn_fused(feat_flat, params["rpn_wh"], params["rpn_bh"],
                            params["rpn_w_head"], params["rpn_b_head"], H, W)
    head = head.reshape(N, H, W2, LANE)[:, :, :W, :]                    # drop junk columns
    obj = head[..., :NUM_ANCHORS].reshape(N, H * W * NUM_ANCHORS)
    deltas = head[..., NUM_ANCHORS:5 * NUM_ANCHORS].reshape(N, H * W, NUM_ANCHORS, 4)

    anchors = make_anchors(H, W, ANCHOR_SIZES)                          # (H*W, A, 4)
    proposals_all = decode_boxes(anchors[None], deltas).reshape(N, -1, 4)

    # TODO(synk): RPN NMS is data-dependent control flow; plain batched top-k instead.
    _, idx = jax.lax.top_k(obj, TOPK)                                   # (N, TOPK)
    props = jnp.take_along_axis(proposals_all, idx[..., None], axis=1)  # (N, TOPK, 4)
    maxvec = jnp.array([W - 1.0, H - 1.0, W - 1.0, H - 1.0], jnp.float32)
    props = jnp.minimum(jnp.maximum(props, 0.0), maxvec)

    # --- roi_heads: vmapped one-hot ROI pooling + fused Pallas box head ---
    pooled = jax.vmap(roi_pool_onehot)(feat, props)                     # (N, TOPK, P)
    pooled_all = pooled.reshape(N * TOPK, -1)
    props_all = props.reshape(N * TOPK, 4)

    head2 = pallas_box_head(pooled_all,
                            params["fc1_w"], params["fc1_b"],
                            params["fc2_w"], params["fc2_b"],
                            params["box_w_head"], params["box_b_head"])
    cls_logits = head2[:, :NUM_CLASSES + 1]
    box_deltas = head2[:, NUM_CLASSES + 1:NUM_CLASSES + 5]
    cls_prob = jax.nn.softmax(cls_logits, axis=-1)
    pred_classes = jnp.argmax(cls_prob[:, :-1], axis=-1)                # exclude background
    pred_scores = jnp.max(cls_prob[:, :-1], axis=-1)

    # --- multimask_apd_detector_postprocess core: one batched Pallas call ---
    scale_cols, clip_cols = [], []
    for n in range(N):
        ih, iw = image_sizes[n]
        out_h = batched_inputs[n].get("height", ih)
        out_w = batched_inputs[n].get("width", iw)
        sx, sy = out_w / iw, out_h / ih
        scale_cols.append(jnp.tile(jnp.array([[sx], [sy], [sx], [sy]], jnp.float32), (1, TOPK)))
        clip_cols.append(jnp.tile(jnp.array([[out_w], [out_h], [out_w], [out_h]], jnp.float32),
                                  (1, TOPK)))
    scale_T = jnp.concatenate(scale_cols, axis=1)                       # (4, N*TOPK)
    clip_T = jnp.concatenate(clip_cols, axis=1)
    final_T = pallas_decode_postprocess(props_all.T, box_deltas.T, scale_T, clip_T)
    final_boxes = final_T.T                                             # (N*TOPK, 4)
    nonempty = (final_boxes[:, 2] > final_boxes[:, 0]) & (final_boxes[:, 3] > final_boxes[:, 1])

    processed_results = []
    for n in range(N):
        sl = slice(n * TOPK, (n + 1) * TOPK)
        # TODO(synk): mask head + paste_masks_in_image and keypoint rescaling omitted
        #             (no mask/keypoint heads in this synthetic config).
        processed_results.append({
            "instances": {
                "pred_boxes": final_boxes[sl],
                "scores": pred_scores[sl],
                "pred_classes": pred_classes[sl],
                "nonempty": nonempty[sl],
            }
        })
    return processed_results


# ================================= main =======================================

if __name__ == "__main__":
    key = jax.random.PRNGKey(0)
    pkey, dkey = jax.random.split(key)
    params = fuse_params(init_params(pkey))

    k1, k2 = jax.random.split(dkey)
    batched_inputs = [
        {"image": jax.random.uniform(k1, (IMG_C, IMG_H, IMG_W), jnp.float32) * 255.0,
         "height": 64, "width": 48},
        {"image": jax.random.uniform(k2, (IMG_C, IMG_H, IMG_W), jnp.float32) * 255.0},
    ]

    results = generalized_rcnn_inference(params, batched_inputs)
    for r in results:
        for v in r["instances"].values():
            jax.block_until_ready(v)

    print("KERNEL_OK")
</pallas_src>

<mosaic_0001>
module attributes {stable_mosaic.version = 11 : i64} {
  func.func @kernel(%arg0: i32, %arg1: memref<512x27xf32, #tpu.memory_space<vmem>>, %arg2: memref<27x32xf32, #tpu.memory_space<vmem>>, %arg3: memref<1x32xf32, #tpu.memory_space<vmem>>, %arg4: memref<512x32xf32, #tpu.memory_space<vmem>>) attributes {dimension_semantics = [#tpu.dimension_semantics<parallel>], iteration_bounds = array<i64: 4>, scalar_prefetch = 0 : i64, scratch_operands = 0 : i64, tpu.core_type = #tpu.core_type<tc>, window_params = [{transform_indices = @transform_0, window_bounds = array<i64: 512, 27>}, {pipeline_mode = #tpu.pipeline_mode<synchronous>, transform_indices = @transform_1, window_bounds = array<i64: 27, 32>}, {pipeline_mode = #tpu.pipeline_mode<synchronous>, transform_indices = @transform_2, window_bounds = array<i64: 1, 32>}, {transform_indices = @transform_3, window_bounds = array<i64: 512, 32>}]} {
    %c0 = arith.constant 0 : index
    %c0_0 = arith.constant 0 : index
    %0 = vector.load %arg1[%c0, %c0_0] : memref<512x27xf32, #tpu.memory_space<vmem>>, vector<512x27xf32>
    %c0_1 = arith.constant 0 : index
    %c0_2 = arith.constant 0 : index
    %1 = vector.load %arg2[%c0_1, %c0_2] : memref<27x32xf32, #tpu.memory_space<vmem>>, vector<27x32xf32>
    %cst = arith.constant dense<0.000000e+00> : vector<512x32xf32>
    %2 = tpu.matmul %0, %1, %cst {dimension_numbers = #tpu.dot_dimension_numbers<[1], [0], [0], [1], [0, 0, 1, 1], [], []>} : vector<512x27xf32>, vector<27x32xf32>, vector<512x32xf32> -> vector<512x32xf32>
    %c0_3 = arith.constant 0 : index
    %c0_4 = arith.constant 0 : index
    %3 = vector.load %arg3[%c0_3, %c0_4] : memref<1x32xf32, #tpu.memory_space<vmem>>, vector<1x32xf32>
    %4 = vector.broadcast %3 : vector<1x32xf32> to vector<512x32xf32>
    %5 = arith.addf %2, %4 : vector<512x32xf32>
    %cst_5 = arith.constant 0.000000e+00 : f32
    %6 = vector.broadcast %cst_5 : f32 to vector<512x32xf32>
    %7 = arith.maximumf %5, %6 : vector<512x32xf32>
    %c0_6 = arith.constant 0 : index
    %c0_7 = arith.constant 0 : index
    %8 = vector.load %arg4[%c0_6, %c0_7] : memref<512x32xf32, #tpu.memory_space<vmem>>, vector<512x32xf32>
    tpu.vector_store %arg4[%c0_6, %c0_7], %7 {strides = array<i32>} : memref<512x32xf32, #tpu.memory_space<vmem>>, vector<512x32xf32>,
    return
  }
  func.func @transform_0(%arg0: i32) -> (i32, i32) {
    %c0_i32 = arith.constant 0 : i32
    %c0_i32_0 = arith.constant 0 : i32
    return %arg0, %c0_i32 : i32, i32
  }
  func.func @transform_1(%arg0: i32) -> (i32, i32) {
    %c0_i32 = arith.constant 0 : i32
    %c0_i32_0 = arith.constant 0 : i32
    %c0_i32_1 = arith.constant 0 : i32
    return %c0_i32, %c0_i32_0 : i32, i32
  }
  func.func @transform_2(%arg0: i32) -> (i32, i32) {
    %c0_i32 = arith.constant 0 : i32
    %c0_i32_0 = arith.constant 0 : i32
    %c0_i32_1 = arith.constant 0 : i32
    return %c0_i32, %c0_i32_0 : i32, i32
  }
  func.func @transform_3(%arg0: i32) -> (i32, i32) {
    %c0_i32 = arith.constant 0 : i32
    %c0_i32_0 = arith.constant 0 : i32
    return %arg0, %c0_i32 : i32, i32
  }
}

</mosaic_0001>

<bundles_post_ra>
// kernel: tpu_custom_call.1
= control target key start
LH: loop header
LB: loop body
LE: loop exit
PB: predicated region body
PF: predicated region fallthrough
CT: control target
= control target key end

     0   :  { %s1317_s12 = smov 0   ;;  %s1682_s0 = inlined_call_operand.vmem [shape: f32[2048,27], index: 0, kind: input, shape index: {}]   ;;  %s1683_s1 = inlined_call_operand.vmem [shape: f32[27,32], index: 1, kind: input, shape index: {}]   ;;  %s1684_s2 = inlined_call_operand.vmem [shape: f32[1,32], index: 2, kind: input, shape index: {}]   ;;  %s1685_s3 = inlined_call_operand.vmem [shape: f32[2048,32], index: 3, kind: output, shape index: {}]  }
   0x1 LB: > { %s1016_s13 = sadd.s32 4294967295, %s1294_s12   ;;  %p1020_p0 = scmp.ge.s32.totalorder %s1294_s12, 1  ;;  %s1294_s12 = sphi %s1317_s12, %s13_s12  }
   0x2   : > { %p138_p1 = scmp.lt.s32.totalorder %s1294_s12, 5 }
   0x4   : > { %p139_p2 = pnand %p1020_p0, %p138_p1 }
   0x5   : > { %v238_v0 = vld [vmem:[%s1683_s1] sm:$0xff] (!%p139_p2)  ;;  %v239_v1 = vld [vmem:[%s1683_s1 + $0x8] sm:$0xff] (!%p139_p2)  ;;  %v240_v2 = vld [vmem:[%s1683_s1 + $0x10] sm:$0xff] (!%p139_p2)  ;;  %vm442_vm0 = vcmask (!%p139_p2), 1042432   ;;  %s1021_s20 = sshll.u32 (!%p139_p2), %s1016_s13, 6  ;;  %vm1296_vm1 = vmmov (!%p139_p2), 1  }
   0x6   : > { %142 = sbr.rel (%p139_p2) target bundleno = 297 (0x129), region = 32  ;;  %v1265_v3 = vpack.c.bf16 (!%p139_p2), %v239_v1, %v238_v0  ;;  %v241_v4 = vld [vmem:[%s1683_s1 + $0x18] sm:$0x7] (!%p139_p2)  ;;  %p163_p3 = scmp.lt.s32.totalorder (!%p139_p2), %s1021_s20, 255  ;;  %vm1270_vm2 = vmpackc.low (!%p139_p2), %vm442_vm0, %vm1296_vm1  ;;  %vm249_vm3 = vcmask (!%p139_p2), 220160   ;;  %vm895_vm4 = vcmask (!%p139_p2), 261120  }
   0x7   : > { %v1269_v5 = vpack.c.bf16 (!%p139_p2), %v241_v4, %v240_v2 }
   0x8   : > { %1266 = vmatprep.subr.bf16.mxu0 (!%p139_p2), %v1265_v3  ;;  %1275 = vmatprep.subr.bf16.mxu1 (!%p139_p2), %v1265_v3 }
   0x9   : > { %1268 = vmatpush3.bf16.msra.mxu0 (!%p139_p2), %v1265_v3  ;;  %1277 = vmatpush3.bf16.msra.mxu1 (!%p139_p2), %v1265_v3 }
   0xa   : > { %1271 = vmatprep.subr.msk.bf16.mxu0 (!%p139_p2), %vm1270_vm2, %v1269_v5  ;;  %1276 = vmatprep.subr.msk.bf16.mxu1 (!%p139_p2), %vm1270_vm2, %v1269_v5 }
   0xd   : > { %s1687_s20 = smov (!%p163_p3, %s1021_s20), 255  ;;  %1274 = vmatpush3.bf16.msk.msra.mxu0 %vm1270_vm2, %v1269_v5  ;;  %1278 = vmatpush3.bf16.msk.msra.mxu1 %vm1270_vm2, %v1269_v5 }
   0xe   : > { %s1022_s23 = sshll.u32 %s1687_s20, 3 }
   0xf   : > { %s1345_s26 = scalar_lea.vmem %s1682_s0, %s1022_s23  ;;  %s1487_s4 = scalar_lea.vmem %s1685_s3, %s1022_s23 }
  0x10   : > { %v174_v6 = vld [vmem:[%s1345_s26] sm:$0xff]  ;;  %v175_v8 = vld [vmem:[%s1345_s26 + $0x8] sm:$0xff]  ;;  %v176_v10 = vld [vmem:[%s1345_s26 + $0x10] sm:$0xff] }
  0x11   : > { %v206_v7 = vld [vmem:[%s1345_s26 + $0x100] sm:$0xff]  ;;  %v207_v9 = vld [vmem:[%s1345_s26 + $0x108] sm:$0xff]  ;;  %1169 = vmatprep.mubr.msk.f32.mxu0 %vm249_vm3, %v174_v6  ;;  %v208_v11 = vld [vmem:[%s1345_s26 + $0x110] sm:$0xff] }
  0x12   : > { %1217 = vmatprep.mubr.msk.f32.mxu1 %vm249_vm3, %v206_v7  ;;  %1170 = vmatmul.mubr.msk.f32.vlgmr.msra.gmra.mrb[0].mxu0 %vm249_vm3, %v175_v8  ;;  %v177_v12 = vld [vmem:[%s1345_s26 + $0x18] sm:$0xff]  ;;  %v178_v14 = vld [vmem:[%s1345_s26 + $0x20] sm:$0xff]  ;;  %v179_v16 = vld [vmem:[%s1345_s26 + $0x28] sm:$0xff] }
  0x13   : > { %1218 = vmatmul.mubr.msk.f32.vlgmr.msra.gmra.mrb[0].mxu1 %vm249_vm3, %v207_v9  ;;  %1172 = vmatprep.mubr.msk.f32.mxu0 %vm249_vm3, %v176_v10  ;;  %v209_v13 = vld [vmem:[%s1345_s26 + $0x118] sm:$0xff]  ;;  %v210_v15 = vld [vmem:[%s1345_s26 + $0x120] sm:$0xff]  ;;  %v211_v17 = vld [vmem:[%s1345_s26 + $0x128] sm:$0xff] }
  0x14   : > { %1220 = vmatprep.mubr.msk.f32.mxu1 %vm249_vm3, %v208_v11  ;;  %v180_v18 = vld [vmem:[%s1345_s26 + $0x30] sm:$0xff]  ;;  %v181_v20 = vld [vmem:[%s1345_s26 + $0x38] sm:$0xff]  ;;  %v182_v22 = vld [vmem:[%s1345_s26 + $0x40] sm:$0xff] }
  0x15   : > { %v212_v19 = vld [vmem:[%s1345_s26 + $0x130] sm:$0xff]  ;;  %v213_v21 = vld [vmem:[%s1345_s26 + $0x138] sm:$0xff]  ;;  %v214_v23 = vld [vmem:[%s1345_s26 + $0x140] sm:$0xff] }
  0x16   : > { %1173 = vmatmul.mubr.msk.f32.gmra.mrb[2].mxu0 %vm249_vm3, %v177_v12  ;;  %v183_v24 = vld [vmem:[%s1345_s26 + $0x48] sm:$0xff]  ;;  %v184_v26 = vld [vmem:[%s1345_s26 + $0x50] sm:$0xff]  ;;  %v185_v28 = vld [vmem:[%s1345_s26 + $0x58] sm:$0xff] }
  0x17   : > { %1221 = vmatmul.mubr.msk.f32.gmra.mrb[2].mxu1 %vm249_vm3, %v209_v13  ;;  %1175 = vmatprep.mubr.msk.f32.mxu0 %vm249_vm3, %v178_v14  ;;  %v215_v25 = vld [vmem:[%s1345_s26 + $0x148] sm:$0xff]  ;;  %v216_v27 = vld [vmem:[%s1345_s26 + $0x150] sm:$0xff]  ;;  %v217_v29 = vld [vmem:[%s1345_s26 + $0x158] sm:$0xff] }
  0x18   : > { %1223 = vmatprep.mubr.msk.f32.mxu1 %vm249_vm3, %v210_v15  ;;  %v186_v30 = vld [vmem:[%s1345_s26 + $0x60] sm:$0xff]  ;;  %v187_v32 = vld [vmem:[%s1345_s26 + $0x68] sm:$0xff]  ;;  %v188_v34 = vld [vmem:[%s1345_s26 + $0x70] sm:$0xff] }
  0x19   : > { %v218_v31 = vld [vmem:[%s1345_s26 + $0x160] sm:$0xff]  ;;  %v219_v33 = vld [vmem:[%s1345_s26 + $0x168] sm:$0xff]  ;;  %v220_v35 = vld [vmem:[%s1345_s26 + $0x170] sm:$0xff] }
  0x1a   : > { %1176 = vmatmul.mubr.msk.f32.gmra.mrb[4].mxu0 %vm249_vm3, %v179_v16  ;;  %v189_v36 = vld [vmem:[%s1345_s26 + $0x78] sm:$0xff]  ;;  %v190_v38 = vld [vmem:[%s1345_s26 + $0x80] sm:$0xff]  ;;  %v191_v40 = vld [vmem:[%s1345_s26 + $0x88] sm:$0xff] }
  0x1b   : > { %1224 = vmatmul.mubr.msk.f32.gmra.mrb[4].mxu1 %vm249_vm3, %v211_v17  ;;  %1178 = vmatprep.mubr.msk.f32.mxu0 %vm249_vm3, %v180_v18  ;;  %v221_v37 = vld [vmem:[%s1345_s26 + $0x178] sm:$0xff]  ;;  %v222_v39 = vld [vmem:[%s1345_s26 + $0x180] sm:$0xff]  ;;  %v223_v41 = vld [vmem:[%s1345_s26 + $0x188] sm:$0xff] }
  0x1c   : > { %1226 = vmatprep.mubr.msk.f32.mxu1 %vm249_vm3, %v212_v19  ;;  %v192_v42 = vld [vmem:[%s1345_s26 + $0x90] sm:$0xff]  ;;  %v193_v44 = vld [vmem:[%s1345_s26 + $0x98] sm:$0xff]  ;;  %v194_v46 = vld [vmem:[%s1345_s26 + $0xa0] sm:$0xff] }
  0x1d   : > { %v224_v43 = vld [vmem:[%s1345_s26 + $0x190] sm:$0xff]  ;;  %v225_v45 = vld [vmem:[%s1345_s26 + $0x198] sm:$0xff]  ;;  %v226_v47 = vld [vmem:[%s1345_s26 + $0x1a0] sm:$0xff] }
  0x1e   : > { %1179 = vmatmul.mubr.msk.f32.gmra.mrb[6].mxu0 %vm249_vm3, %v181_v20  ;;  %v195_v48 = vld [vmem:[%s1345_s26 + $0xa8] sm:$0xff]  ;;  %v196_v50 = vld [vmem:[%s1345_s26 + $0xb0] sm:$0xff]  ;;  %v197_v52 = vld [vmem:[%s1345_s26 + $0xb8] sm:$0xff] }
  0x1f   : > { %1227 = vmatmul.mubr.msk.f32.gmra.mrb[6].mxu1 %vm249_vm3, %v213_v21  ;;  %1181 = vmatprep.mubr.msk.f32.mxu0 %vm249_vm3, %v182_v22  ;;  %v227_v49 = vld [vmem:[%s1345_s26 + $0x1a8] sm:$0xff]  ;;  %v228_v51 = vld [vmem:[%s1345_s26 + $0x1b0] sm:$0xff]  ;;  %v229_v53 = vld [vmem:[%s1345_s26 + $0x1b8] sm:$0xff] }
  0x20   : > { %1229 = vmatprep.mubr.msk.f32.mxu1 %vm249_vm3, %v214_v23  ;;  %v198_v54 = vld [vmem:[%s1345_s26 + $0xc0] sm:$0xff]  ;;  %v199_v56 = vld [vmem:[%s1345_s26 + $0xc8] sm:$0xff]  ;;  %v200_v58 = vld [vmem:[%s1345_s26 + $0xd0] sm:$0xff] }
  0x21   : > { %v230_v55 = vld [vmem:[%s1345_s26 + $0x1c0] sm:$0xff]  ;;  %v231_v57 = vld [vmem:[%s1345_s26 + $0x1c8] sm:$0xff]  ;;  %v232_v59 = vld [vmem:[%s1345_s26 + $0x1d0] sm:$0xff] }
  0x22   : > { %1182 = vmatmul.mubr.msk.f32.gmra.mrb[8].mxu0 %vm249_vm3, %v183_v24  ;;  %v201_v60 = vld [vmem:[%s1345_s26 + $0xd8] sm:$0xff]  ;;  %v202_v62 = vld [vmem:[%s1345_s26 + $0xe0] sm:$0xff]  ;;  %v203_v0 = vld [vmem:[%s1345_s26 + $0xe8] sm:$0xff] }
  0x23   : > { %1230 = vmatmul.mubr.msk.f32.gmra.mrb[8].mxu1 %vm249_vm3, %v215_v25  ;;  %1184 = vmatprep.mubr.msk.f32.mxu0 %vm249_vm3, %v184_v26  ;;  %v233_v61 = vld [vmem:[%s1345_s26 + $0x1d8] sm:$0xff]  ;;  %v234_v63 = vld [vmem:[%s1345_s26 + $0x1e0] sm:$0xff]  ;;  %v235_v1 = vld [vmem:[%s1345_s26 + $0x1e8] sm:$0xff] }
  0x24   : > { %1232 = vmatprep.mubr.msk.f32.mxu1 %vm249_vm3, %v216_v27  ;;  %v204_v2 = vld [vmem:[%s1345_s26 + $0xf0] sm:$0xff]  ;;  %v205_v4 = vld [vmem:[%s1345_s26 + $0xf8] sm:$0xff]  ;;  %v1478_v6 = vld [vmem:[%s1684_s2] ss:$0 sm:$0xff] }
  0x25   : > { %v236_v3 = vld [vmem:[%s1345_s26 + $0x1f0] sm:$0xff]  ;;  %v237_v5 = vld [vmem:[%s1345_s26 + $0x1f8] sm:$0xff] }
  0x26   : > { %1185 = vmatmul.mubr.msk.f32.gmra.mrb[10].mxu0 %vm249_vm3, %v185_v28 }
  0x27   : > { %1233 = vmatmul.mubr.msk.f32.gmra.mrb[10].mxu1 %vm249_vm3, %v217_v29  ;;  %1187 = vmatprep.mubr.msk.f32.mxu0 %vm249_vm3, %v186_v30 }
  0x28   : > { %1235 = vmatprep.mubr.msk.f32.mxu1 %vm249_vm3, %v218_v31 }
  0x2a   : > { %1188 = vmatmul.mubr.msk.f32.gmra.mrb[12].mxu0 %vm249_vm3, %v187_v32 }
  0x2b   : > { %1236 = vmatmul.mubr.msk.f32.gmra.mrb[12].mxu1 %vm249_vm3, %v219_v33  ;;  %1190 = vmatprep.mubr.msk.f32.mxu0 %vm249_vm3, %v188_v34 }
  0x2c   : > { %1238 = vmatprep.mubr.msk.f32.mxu1 %vm249_vm3, %v220_v35 }
  0x2e   : > { %1191 = vmatmul.mubr.msk.f32.gmra.mrb[14].mxu0 %vm249_vm3, %v189_v36 }
  0x2f   : > { %1239 = vmatmul.mubr.msk.f32.gmra.mrb[14].mxu1 %vm249_vm3, %v221_v37  ;;  %1193 = vmatprep.mubr.msk.f32.mxu0 %vm249_vm3, %v190_v38 }
  0x30   : > { %1241 = vmatprep.mubr.msk.f32.mxu1 %vm249_vm3, %v222_v39 }
  0x32   : > { %1194 = vmatmul.mubr.msk.f32.gmra.mrb[16].mxu0 %vm249_vm3, %v191_v40 }
  0x33   : > { %1242 = vmatmul.mubr.msk.f32.gmra.mrb[16].mxu1 %vm249_vm3, %v223_v41  ;;  %1196 = vmatprep.mubr.msk.f32.mxu0 %vm249_vm3, %v192_v42 }
  0x34   : > { %1244 = vmatprep.mubr.msk.f32.mxu1 %vm249_vm3, %v224_v43 }
  0x36   : > { %1197 = vmatmul.mubr.msk.f32.gmra.mrb[18].mxu0 %vm249_vm3, %v193_v44 }
  0x37   : > { %1245 = vmatmul.mubr.msk.f32.gmra.mrb[18].mxu1 %vm249_vm3, %v225_v45  ;;  %1199 = vmatprep.mubr.msk.f32.mxu0 %vm249_vm3, %v194_v46 }
  0x38   : > { %1247 = vmatprep.mubr.msk.f32.mxu1 %vm249_vm3, %v226_v47 }
  0x3a   : > { %1200 = vmatmul.mubr.msk.f32.gmra.mrb[20].mxu0 %vm249_vm3, %v195_v48 }
  0x3b   : > { %1248 = vmatmul.mubr.msk.f32.gmra.mrb[20].mxu1 %vm249_vm3, %v227_v49  ;;  %1202 = vmatprep.mubr.msk.f32.mxu0 %vm249_vm3, %v196_v50 }
  0x3c   : > { %1250 = vmatprep.mubr.msk.f32.mxu1 %vm249_vm3, %v228_v51 }
  0x3e   : > { %1203 = vmatmul.mubr.msk.f32.gmra.mrb[22].mxu0 %vm249_vm3, %v197_v52 }
  0x3f   : > { %1251 = vmatmul.mubr.msk.f32.gmra.mrb[22].mxu1 %vm249_vm3, %v229_v53  ;;  %1205 = vmatprep.mubr.msk.f32.mxu0 %vm249_vm3, %v198_v54 }
  0x40   : > { %1253 = vmatprep.mubr.msk.f32.mxu1 %vm249_vm3, %v230_v55 }
  0x42   : > { %1206 = vmatmul.mubr.msk.f32.gmra.mrb[24].mxu0 %vm249_vm3, %v199_v56 }
  0x43   : > { %1254 = vmatmul.mubr.msk.f32.gmra.mrb[24].mxu1 %vm249_vm3, %v231_v57  ;;  %1208 = vmatprep.mubr.msk.f32.mxu0 %vm249_vm3, %v200_v58 }
  0x44   : > { %1256 = vmatprep.mubr.msk.f32.mxu1 %vm249_vm3, %v232_v59 }
  0x46   : > { %1209 = vmatmul.mubr.msk.f32.gmra.mrb[26].mxu0 %vm249_vm3, %v201_v60 }
  0x47   : > { %1257 = vmatmul.mubr.msk.f32.gmra.mrb[26].mxu1 %vm249_vm3, %v233_v61  ;;  %1211 = vmatprep.mubr.msk.f32.mxu0 %vm249_vm3, %v202_v62 }
  0x48   : > { %1259 = vmatprep.mubr.msk.f32.mxu1 %vm249_vm3, %v234_v63 }
  0x4a   : > { %1212 = vmatmul.mubr.msk.f32.gmra.mrb[28].mxu0 %vm249_vm3, %v203_v0 }
  0x4b   : > { %1260 = vmatmul.mubr.msk.f32.gmra.mrb[28].mxu1 %vm249_vm3, %v235_v1  ;;  %1214 = vmatprep.mubr.msk.f32.mxu0 %vm249_vm3, %v204_v2 }
  0x4c   : > { %1262 = vmatprep.mubr.msk.f32.mxu1 %vm249_vm3, %v236_v3 }
  0x4e   : > { %1215 = vmatmul.mubr.msk.f32.gmra.mrb[30].mxu0 %vm249_vm3, %v205_v4 }
  0x4f   : > { %1263 = vmatmul.mubr.msk.f32.gmra.mrb[30].mxu1 %vm249_vm3, %v237_v5 }
  0xe5   : > { %v1171_v7 = vpop.f32.mrb[0].mxu0 }
  0xe6   : > { %v1219_v8 = vpop.f32.mrb[0].mxu1  ;;  %v518_v9 = vadd.f32 %v1171_v7, %v1478_v6  ;;  %v512_v11 = vpop.f32.mrb[1].mxu0 }
  0xe7   : > { %v678_v10 = vadd.f32 %v1219_v8, %v1478_v6  ;;  %v672_v12 = vpop.f32.mrb[1].mxu1  ;;  %v513_v13 = vadd.f32 %v1478_v6, %v512_v11 }
  0xe8   : > { %v673_v14 = vadd.f32 %v1478_v6, %v672_v12  ;;  %v832_v15 = vmax.f32 %v518_v9, 0.0 }
  0xe9   : > { %v864_v16 = vmax.f32 %v678_v10, 0.0  ;;  %v831_v17 = vmax.f32 %v513_v13, 0.0  ;;  %v1174_v19 = vpop.f32.mrb[2].mxu0 }
  0xea   : > { %v863_v18 = vmax.f32 %v673_v14, 0.0  ;;  %v1222_v20 = vpop.f32.mrb[2].mxu1  ;;  %897 = vst.msk [vmem:[%s1487_s4 + $0x8] sm:$0xff] %vm895_vm4, %v832_v15  ;;  %v528_v21 = vadd.f32 %v1174_v19, %v1478_v6  ;;  %v522_v23 = vpop.f32.mrb[3].mxu0 }
  0xeb   : > { %929 = vst.msk [vmem:[%s1487_s4 + $0x108] sm:$0xff] %vm895_vm4, %v864_v16  ;;  %v688_v22 = vadd.f32 %v1222_v20, %v1478_v6  ;;  %v682_v24 = vpop.f32.mrb[3].mxu1  ;;  %896 = vst.msk [vmem:[%s1487_s4] sm:$0xff] %vm895_vm4, %v831_v17  ;;  %v523_v25 = vadd.f32 %v1478_v6, %v522_v23 }
  0xec   : > { %928 = vst.msk [vmem:[%s1487_s4 + $0x100] sm:$0xff] %vm895_vm4, %v863_v18  ;;  %v683_v26 = vadd.f32 %v1478_v6, %v682_v24  ;;  %v834_v27 = vmax.f32 %v528_v21, 0.0 }
  0xed   : > { %v866_v28 = vmax.f32 %v688_v22, 0.0  ;;  %v833_v29 = vmax.f32 %v523_v25, 0.0  ;;  %v1177_v31 = vpop.f32.mrb[4].mxu0 }
  0xee   : > { %v865_v30 = vmax.f32 %v683_v26, 0.0  ;;  %v1225_v32 = vpop.f32.mrb[4].mxu1  ;;  %899 = vst.msk [vmem:[%s1487_s4 + $0x18] sm:$0xff] %vm895_vm4, %v834_v27  ;;  %v538_v33 = vadd.f32 %v1177_v31, %v1478_v6  ;;  %v532_v35 = vpop.f32.mrb[5].mxu0 }
  0xef   : > { %931 = vst.msk [vmem:[%s1487_s4 + $0x118] sm:$0xff] %vm895_vm4, %v866_v28  ;;  %v698_v34 = vadd.f32 %v1225_v32, %v1478_v6  ;;  %v692_v36 = vpop.f32.mrb[5].mxu1  ;;  %898 = vst.msk [vmem:[%s1487_s4 + $0x10] sm:$0xff] %vm895_vm4, %v833_v29  ;;  %v533_v37 = vadd.f32 %v1478_v6, %v532_v35 }
  0xf0   : > { %930 = vst.msk [vmem:[%s1487_s4 + $0x110] sm:$0xff] %vm895_vm4, %v865_v30  ;;  %v693_v38 = vadd.f32 %v1478_v6, %v692_v36  ;;  %v836_v39 = vmax.f32 %v538_v33, 0.0 }
  0xf1   : > { %v868_v40 = vmax.f32 %v698_v34, 0.0  ;;  %v835_v41 = vmax.f32 %v533_v37, 0.0  ;;  %v1180_v43 = vpop.f32.mrb[6].mxu0 }
  0xf2   : > { %v867_v42 = vmax.f32 %v693_v38, 0.0  ;;  %v1228_v44 = vpop.f32.mrb[6].mxu1  ;;  %901 = vst.msk [vmem:[%s1487_s4 + $0x28] sm:$0xff] %vm895_vm4, %v836_v39  ;;  %v548_v45 = vadd.f32 %v1180_v43, %v1478_v6  ;;  %v542_v47 = vpop.f32.mrb[7].mxu0 }
  0xf3   : > { %933 = vst.msk [vmem:[%s1487_s4 + $0x128] sm:$0xff] %vm895_vm4, %v868_v40  ;;  %v708_v46 = vadd.f32 %v1228_v44, %v1478_v6  ;;  %v702_v48 = vpop.f32.mrb[7].mxu1  ;;  %900 = vst.msk [vmem:[%s1487_s4 + $0x20] sm:$0xff] %vm895_vm4, %v835_v41  ;;  %v543_v49 = vadd.f32 %v1478_v6, %v542_v47 }
  0xf4   : > { %932 = vst.msk [vmem:[%s1487_s4 + $0x120] sm:$0xff] %vm895_vm4, %v867_v42  ;;  %v703_v50 = vadd.f32 %v1478_v6, %v702_v48  ;;  %v838_v51 = vmax.f32 %v548_v45, 0.0 }
  0xf5   : > { %v870_v52 = vmax.f32 %v708_v46, 0.0  ;;  %v837_v53 = vmax.f32 %v543_v49, 0.0  ;;  %v1183_v55 = vpop.f32.mrb[8].mxu0 }
  0xf6   : > { %v869_v54 = vmax.f32 %v703_v50, 0.0  ;;  %v1231_v56 = vpop.f32.mrb[8].mxu1  ;;  %903 = vst.msk [vmem:[%s1487_s4 + $0x38] sm:$0xff] %vm895_vm4, %v838_v51  ;;  %v558_v57 = vadd.f32 %v1183_v55, %v1478_v6  ;;  %v552_v59 = vpop.f32.mrb[9].mxu0 }
  0xf7   : > { %935 = vst.msk [vmem:[%s1487_s4 + $0x138] sm:$0xff] %vm895_vm4, %v870_v52  ;;  %v718_v58 = vadd.f32 %v1231_v56, %v1478_v6  ;;  %v712_v60 = vpop.f32.mrb[9].mxu1  ;;  %902 = vst.msk [vmem:[%s1487_s4 + $0x30] sm:$0xff] %vm895_vm4, %v837_v53  ;;  %v553_v61 = vadd.f32 %v1478_v6, %v552_v59 }
  0xf8   : > { %934 = vst.msk [vmem:[%s1487_s4 + $0x130] sm:$0xff] %vm895_vm4, %v869_v54  ;;  %v713_v62 = vadd.f32 %v1478_v6, %v712_v60  ;;  %v840_v63 = vmax.f32 %v558_v57, 0.0 }
  0xf9   : > { %v872_v0 = vmax.f32 %v718_v58, 0.0  ;;  %v839_v1 = vmax.f32 %v553_v61, 0.0  ;;  %v1186_v3 = vpop.f32.mrb[10].mxu0 }
  0xfa   : > { %v871_v2 = vmax.f32 %v713_v62, 0.0  ;;  %v1234_v4 = vpop.f32.mrb[10].mxu1  ;;  %905 = vst.msk [vmem:[%s1487_s4 + $0x48] sm:$0xff] %vm895_vm4, %v840_v63  ;;  %v568_v5 = vadd.f32 %v1186_v3, %v1478_v6  ;;  %v562_v8 = vpop.f32.mrb[11].mxu0 }
  0xfb   : > { %937 = vst.msk [vmem:[%s1487_s4 + $0x148] sm:$0xff] %vm895_vm4, %v872_v0  ;;  %v728_v7 = vadd.f32 %v1234_v4, %v1478_v6  ;;  %v722_v9 = vpop.f32.mrb[11].mxu1  ;;  %904 = vst.msk [vmem:[%s1487_s4 + $0x40] sm:$0xff] %vm895_vm4, %v839_v1  ;;  %v563_v10 = vadd.f32 %v1478_v6, %v562_v8 }
  0xfc   : > { %936 = vst.msk [vmem:[%s1487_s4 + $0x140] sm:$0xff] %vm895_vm4, %v871_v2  ;;  %v723_v11 = vadd.f32 %v1478_v6, %v722_v9  ;;  %v842_v12 = vmax.f32 %v568_v5, 0.0 }
  0xfd   : > { %v874_v13 = vmax.f32 %v728_v7, 0.0  ;;  %v841_v14 = vmax.f32 %v563_v10, 0.0  ;;  %v1189_v16 = vpop.f32.mrb[12].mxu0 }
  0xfe   : > { %v873_v15 = vmax.f32 %v723_v11, 0.0  ;;  %v1237_v17 = vpop.f32.mrb[12].mxu1  ;;  %907 = vst.msk [vmem:[%s1487_s4 + $0x58] sm:$0xff] %vm895_vm4, %v842_v12  ;;  %v578_v18 = vadd.f32 %v1189_v16, %v1478_v6  ;;  %v572_v20 = vpop.f32.mrb[13].mxu0 }
  0xff   : > { %939 = vst.msk [vmem:[%s1487_s4 + $0x158] sm:$0xff] %vm895_vm4, %v874_v13  ;;  %v738_v19 = vadd.f32 %v1237_v17, %v1478_v6  ;;  %v732_v21 = vpop.f32.mrb[13].mxu1  ;;  %906 = vst.msk [vmem:[%s1487_s4 + $0x50] sm:$0xff] %vm895_vm4, %v841_v14  ;;  %v573_v22 = vadd.f32 %v1478_v6, %v572_v20 }
 0x100   : > { %938 = vst.msk [vmem:[%s1487_s4 + $0x150] sm:$0xff] %vm895_vm4, %v873_v15  ;;  %v733_v23 = vadd.f32 %v1478_v6, %v732_v21  ;;  %v844_v24 = vmax.f32 %v578_v18, 0.0 }
 0x101   : > { %v876_v25 = vmax.f32 %v738_v19, 0.0  ;;  %v843_v26 = vmax.f32 %v573_v22, 0.0  ;;  %v1192_v28 = vpop.f32.mrb[14].mxu0 }
 0x102   : > { %v875_v27 = vmax.f32 %v733_v23, 0.0  ;;  %v1240_v29 = vpop.f32.mrb[14].mxu1  ;;  %909 = vst.msk [vmem:[%s1487_s4 + $0x68] sm:$0xff] %vm895_vm4, %v844_v24  ;;  %v588_v30 = vadd.f32 %v1192_v28, %v1478_v6  ;;  %v582_v32 = vpop.f32.mrb[15].mxu0 }
 0x103   : > { %941 = vst.msk [vmem:[%s1487_s4 + $0x168] sm:$0xff] %vm895_vm4, %v876_v25  ;;  %v748_v31 = vadd.f32 %v1240_v29, %v1478_v6  ;;  %v742_v33 = vpop.f32.mrb[15].mxu1  ;;  %908 = vst.msk [vmem:[%s1487_s4 + $0x60] sm:$0xff] %vm895_vm4, %v843_v26  ;;  %v583_v34 = vadd.f32 %v1478_v6, %v582_v32 }
 0x104   : > { %940 = vst.msk [vmem:[%s1487_s4 + $0x160] sm:$0xff] %vm895_vm4, %v875_v27  ;;  %v743_v35 = vadd.f32 %v1478_v6, %v742_v33  ;;  %v846_v36 = vmax.f32 %v588_v30, 0.0 }
 0x105   : > { %v878_v37 = vmax.f32 %v748_v31, 0.0  ;;  %v845_v38 = vmax.f32 %v583_v34, 0.0  ;;  %v1195_v40 = vpop.f32.mrb[16].mxu0 }
 0x106   : > { %v877_v39 = vmax.f32 %v743_v35, 0.0  ;;  %v1243_v41 = vpop.f32.mrb[16].mxu1  ;;  %911 = vst.msk [vmem:[%s1487_s4 + $0x78] sm:$0xff] %vm895_vm4, %v846_v36  ;;  %v598_v42 = vadd.f32 %v1195_v40, %v1478_v6  ;;  %v592_v44 = vpop.f32.mrb[17].mxu0 }
 0x107   : > { %943 = vst.msk [vmem:[%s1487_s4 + $0x178] sm:$0xff] %vm895_vm4, %v878_v37  ;;  %v758_v43 = vadd.f32 %v1243_v41, %v1478_v6  ;;  %v752_v45 = vpop.f32.mrb[17].mxu1  ;;  %910 = vst.msk [vmem:[%s1487_s4 + $0x70] sm:$0xff] %vm895_vm4, %v845_v38  ;;  %v593_v46 = vadd.f32 %v1478_v6, %v592_v44 }
 0x108   : > { %942 = vst.msk [vmem:[%s1487_s4 + $0x170] sm:$0xff] %vm895_vm4, %v877_v39  ;;  %v753_v47 = vadd.f32 %v1478_v6, %v752_v45  ;;  %v848_v48 = vmax.f32 %v598_v42, 0.0 }
 0x109   : > { %v880_v49 = vmax.f32 %v758_v43, 0.0  ;;  %v847_v50 = vmax.f32 %v593_v46, 0.0  ;;  %v1198_v52 = vpop.f32.mrb[18].mxu0 }
 0x10a   : > { %v879_v51 = vmax.f32 %v753_v47, 0.0  ;;  %v1246_v53 = vpop.f32.mrb[18].mxu1  ;;  %913 = vst.msk [vmem:[%s1487_s4 + $0x88] sm:$0xff] %vm895_vm4, %v848_v48  ;;  %v608_v54 = vadd.f32 %v1198_v52, %v1478_v6  ;;  %v602_v56 = vpop.f32.mrb[19].mxu0 }
 0x10b   : > { %945 = vst.msk [vmem:[%s1487_s4 + $0x188] sm:$0xff] %vm895_vm4, %v880_v49  ;;  %v768_v55 = vadd.f32 %v1246_v53, %v1478_v6  ;;  %v762_v57 = vpop.f32.mrb[19].mxu1  ;;  %912 = vst.msk [vmem:[%s1487_s4 + $0x80] sm:$0xff] %vm895_vm4, %v847_v50  ;;  %v603_v58 = vadd.f32 %v1478_v6, %v602_v56 }
 0x10c   : > { %944 = vst.msk [vmem:[%s1487_s4 + $0x180] sm:$0xff] %vm895_vm4, %v879_v51  ;;  %v763_v59 = vadd.f32 %v1478_v6, %v762_v57  ;;  %v850_v60 = vmax.f32 %v608_v54, 0.0 }
 0x10d   : > { %v882_v61 = vmax.f32 %v768_v55, 0.0  ;;  %v849_v62 = vmax.f32 %v603_v58, 0.0  ;;  %v1201_v0 = vpop.f32.mrb[20].mxu0 }
 0x10e   : > { %v881_v63 = vmax.f32 %v763_v59, 0.0  ;;  %v1249_v1 = vpop.f32.mrb[20].mxu1  ;;  %915 = vst.msk [vmem:[%s1487_s4 + $0x98] sm:$0xff] %vm895_vm4, %v850_v60  ;;  %v618_v2 = vadd.f32 %v1201_v0, %v1478_v6  ;;  %v612_v4 = vpop.f32.mrb[21].mxu0 }
 0x10f   : > { %947 = vst.msk [vmem:[%s1487_s4 + $0x198] sm:$0xff] %vm895_vm4, %v882_v61  ;;  %v778_v3 = vadd.f32 %v1249_v1, %v1478_v6  ;;  %v772_v5 = vpop.f32.mrb[21].mxu1  ;;  %914 = vst.msk [vmem:[%s1487_s4 + $0x90] sm:$0xff] %vm895_vm4, %v849_v62  ;;  %v613_v7 = vadd.f32 %v1478_v6, %v612_v4 }
 0x110   : > { %946 = vst.msk [vmem:[%s1487_s4 + $0x190] sm:$0xff] %vm895_vm4, %v881_v63  ;;  %v773_v8 = vadd.f32 %v1478_v6, %v772_v5  ;;  %v852_v9 = vmax.f32 %v618_v2, 0.0 }
 0x111   : > { %v884_v10 = vmax.f32 %v778_v3, 0.0  ;;  %v851_v11 = vmax.f32 %v613_v7, 0.0  ;;  %v1204_v13 = vpop.f32.mrb[22].mxu0 }
 0x112   : > { %v883_v12 = vmax.f32 %v773_v8, 0.0  ;;  %v1252_v14 = vpop.f32.mrb[22].mxu1  ;;  %917 = vst.msk [vmem:[%s1487_s4 + $0xa8] sm:$0xff] %vm895_vm4, %v852_v9  ;;  %v628_v15 = vadd.f32 %v1204_v13, %v1478_v6  ;;  %v622_v17 = vpop.f32.mrb[23].mxu0 }
 0x113   : > { %949 = vst.msk [vmem:[%s1487_s4 + $0x1a8] sm:$0xff] %vm895_vm4, %v884_v10  ;;  %v788_v16 = vadd.f32 %v1252_v14, %v1478_v6  ;;  %v782_v18 = vpop.f32.mrb[23].mxu1  ;;  %916 = vst.msk [vmem:[%s1487_s4 + $0xa0] sm:$0xff] %vm895_vm4, %v851_v11  ;;  %v623_v19 = vadd.f32 %v1478_v6, %v622_v17 }
 0x114   : > { %948 = vst.msk [vmem:[%s1487_s4 + $0x1a0] sm:$0xff] %vm895_vm4, %v883_v12  ;;  %v783_v20 = vadd.f32 %v1478_v6, %v782_v18  ;;  %v854_v21 = vmax.f32 %v628_v15, 0.0 }
 0x115   : > { %v886_v22 = vmax.f32 %v788_v16, 0.0  ;;  %v853_v23 = vmax.f32 %v623_v19, 0.0  ;;  %v1207_v25 = vpop.f32.mrb[24].mxu0 }
 0x116   : > { %v885_v24 = vmax.f32 %v783_v20, 0.0  ;;  %v1255_v26 = vpop.f32.mrb[24].mxu1  ;;  %919 = vst.msk [vmem:[%s1487_s4 + $0xb8] sm:$0xff] %vm895_vm4, %v854_v21  ;;  %v638_v27 = vadd.f32 %v1207_v25, %v1478_v6  ;;  %v632_v29 = vpop.f32.mrb[25].mxu0 }
 0x117   : > { %951 = vst.msk [vmem:[%s1487_s4 + $0x1b8] sm:$0xff] %vm895_vm4, %v886_v22  ;;  %v798_v28 = vadd.f32 %v1255_v26, %v1478_v6  ;;  %v792_v30 = vpop.f32.mrb[25].mxu1  ;;  %918 = vst.msk [vmem:[%s1487_s4 + $0xb0] sm:$0xff] %vm895_vm4, %v853_v23  ;;  %v633_v31 = vadd.f32 %v1478_v6, %v632_v29 }
 0x118   : > { %950 = vst.msk [vmem:[%s1487_s4 + $0x1b0] sm:$0xff] %vm895_vm4, %v885_v24  ;;  %v793_v32 = vadd.f32 %v1478_v6, %v792_v30  ;;  %v856_v33 = vmax.f32 %v638_v27, 0.0 }
 0x119   : > { %v888_v34 = vmax.f32 %v798_v28, 0.0  ;;  %v855_v35 = vmax.f32 %v633_v31, 0.0  ;;  %v1210_v37 = vpop.f32.mrb[26].mxu0 }
 0x11a   : > { %v887_v36 = vmax.f32 %v793_v32, 0.0  ;;  %v1258_v38 = vpop.f32.mrb[26].mxu1  ;;  %921 = vst.msk [vmem:[%s1487_s4 + $0xc8] sm:$0xff] %vm895_vm4, %v856_v33  ;;  %v648_v39 = vadd.f32 %v1210_v37, %v1478_v6  ;;  %v642_v41 = vpop.f32.mrb[27].mxu0 }
 0x11b   : > { %953 = vst.msk [vmem:[%s1487_s4 + $0x1c8] sm:$0xff] %vm895_vm4, %v888_v34  ;;  %v808_v40 = vadd.f32 %v1258_v38, %v1478_v6  ;;  %v802_v42 = vpop.f32.mrb[27].mxu1  ;;  %920 = vst.msk [vmem:[%s1487_s4 + $0xc0] sm:$0xff] %vm895_vm4, %v855_v35  ;;  %v643_v43 = vadd.f32 %v1478_v6, %v642_v41 }
 0x11c   : > { %952 = vst.msk [vmem:[%s1487_s4 + $0x1c0] sm:$0xff] %vm895_vm4, %v887_v36  ;;  %v803_v44 = vadd.f32 %v1478_v6, %v802_v42  ;;  %v858_v45 = vmax.f32 %v648_v39, 0.0 }
 0x11d   : > { %v890_v46 = vmax.f32 %v808_v40, 0.0  ;;  %v857_v47 = vmax.f32 %v643_v43, 0.0  ;;  %v1213_v49 = vpop.f32.mrb[28].mxu0 }
 0x11e   : > { %v889_v48 = vmax.f32 %v803_v44, 0.0  ;;  %v1261_v50 = vpop.f32.mrb[28].mxu1  ;;  %923 = vst.msk [vmem:[%s1487_s4 + $0xd8] sm:$0xff] %vm895_vm4, %v858_v45  ;;  %v658_v51 = vadd.f32 %v1213_v49, %v1478_v6  ;;  %v652_v53 = vpop.f32.mrb[29].mxu0 }
 0x11f   : > { %955 = vst.msk [vmem:[%s1487_s4 + $0x1d8] sm:$0xff] %vm895_vm4, %v890_v46  ;;  %v818_v52 = vadd.f32 %v1261_v50, %v1478_v6  ;;  %v812_v54 = vpop.f32.mrb[29].mxu1  ;;  %922 = vst.msk [vmem:[%s1487_s4 + $0xd0] sm:$0xff] %vm895_vm4, %v857_v47  ;;  %v653_v55 = vadd.f32 %v1478_v6, %v652_v53 }
 0x120   : > { %954 = vst.msk [vmem:[%s1487_s4 + $0x1d0] sm:$0xff] %vm895_vm4, %v889_v48  ;;  %v813_v56 = vadd.f32 %v1478_v6, %v812_v54  ;;  %v860_v57 = vmax.f32 %v658_v51, 0.0 }
 0x121   : > { %v892_v58 = vmax.f32 %v818_v52, 0.0  ;;  %v859_v59 = vmax.f32 %v653_v55, 0.0  ;;  %v1216_v61 = vpop.f32.mrb[30].mxu0 }
 0x122   : > { %v891_v60 = vmax.f32 %v813_v56, 0.0  ;;  %v1264_v62 = vpop.f32.mrb[30].mxu1  ;;  %925 = vst.msk [vmem:[%s1487_s4 + $0xe8] sm:$0xff] %vm895_vm4, %v860_v57  ;;  %v668_v63 = vadd.f32 %v1216_v61, %v1478_v6  ;;  %v662_v1 = vpop.f32.mrb[31].mxu0 }
 0x123   : > { %957 = vst.msk [vmem:[%s1487_s4 + $0x1e8] sm:$0xff] %vm895_vm4, %v892_v58  ;;  %v828_v0 = vadd.f32 %v1264_v62, %v1478_v6  ;;  %v822_v2 = vpop.f32.mrb[31].mxu1  ;;  %924 = vst.msk [vmem:[%s1487_s4 + $0xe0] sm:$0xff] %vm895_vm4, %v859_v59  ;;  %v663_v3 = vadd.f32 %v1478_v6, %v662_v1 }
 0x124   : > { %956 = vst.msk [vmem:[%s1487_s4 + $0x1e0] sm:$0xff] %vm895_vm4, %v891_v60  ;;  %v823_v4 = vadd.f32 %v1478_v6, %v822_v2  ;;  %v862_v5 = vmax.f32 %v668_v63, 0.0 }
 0x125   : > { %v894_v7 = vmax.f32 %v828_v0, 0.0  ;;  %v861_v8 = vmax.f32 %v663_v3, 0.0 }
 0x126   : > { %v893_v9 = vmax.f32 %v823_v4, 0.0  ;;  %927 = vst.msk [vmem:[%s1487_s4 + $0xf8] sm:$0xff] %vm895_vm4, %v862_v5 }
 0x127   : > { %959 = vst.msk [vmem:[%s1487_s4 + $0x1f8] sm:$0xff] %vm895_vm4, %v894_v7  ;;  %926 = vst.msk [vmem:[%s1487_s4 + $0xf0] sm:$0xff] %vm895_vm4, %v861_v8 }
 0x128   : > { %958 = vst.msk [vmem:[%s1487_s4 + $0x1f0] sm:$0xff] %vm895_vm4, %v893_v9 }
 0x129 PF: > { %s13_s12 = sadd.s32 1, %s1294_s12  }
 0x12a   : > { %p10_p4 = scmp.ge.s32.totalorder %s13_s12, 6  }
 0x12c   :  { %12 = sbr.rel (!%p10_p4) target bundleno = 1 (0x1), region = 62 }

</bundles_post_ra>
